<compile_context>
chip_gen: v7x
topology: tpu7x:2x2x1
jax: 0.10.0
libtpu: 0.0.40
codegen_flags: <defaults>
</compile_context>

<pallas_src>
import functools

import jax
import jax.numpy as jnp
from jax.experimental import pallas as pl
from jax.experimental.pallas import tpu as pltpu

LANES = 128
MAX_TILE_ROWS = 8192          # 8192 x 128 x 4 B = 4 MiB per input block
ACC_ROWS = 512                # fixed accumulator: 512 x 128 x 4 B = 256 KiB
PAD_LOGIT = 30.0              # (pred=+30, target=1) -> exactly 0 focal loss (gamma>0)
VMEM_LIMIT_BYTES = 32 * 1024 * 1024


def _cdiv(a: int, b: int) -> int:
    return -(-a // b)


def _round_up(x: int, m: int) -> int:
    return _cdiv(x, m) * m


def _int_pow(x, gamma: float):
    """x**gamma, specialized to repeated multiplies for small integer gamma."""
    g = float(gamma)
    if g == 0.0:
        return jnp.ones_like(x)
    if g.is_integer() and 1.0 <= g <= 4.0:
        out = x
        for _ in range(int(g) - 1):
            out = out * x
        return out
    return jnp.power(x, jnp.float32(g))


def _focal_elem(x, t, alpha: float, gamma: float):
    """Per-element focal loss for one f32 chunk (pure VPU/EUP work)."""
    e = jnp.exp(-jnp.abs(x))                    # one exp per element
    d = 1.0 + e
    # Numerically-stable BCE with logits (PyTorch formula); log1p(e) == log(d).
    bce = jnp.maximum(x, 0.0) - x * t + jnp.log(d)
    # Approx reciprocal (EUP slot) + one Newton step keeps ~f32 accuracy.
    r = pl.reciprocal(d, approx=True)
    r = r * (2.0 - d * r)
    p = jnp.where(x >= 0.0, r, e * r)           # sigmoid(x), exact form
    pos = t == 1.0
    one_m_pt = jnp.where(pos, 1.0 - p, p)       # 1 - pt
    # alpha_t = where(t==1, alpha, 1-alpha) without a second select.
    alpha_t = jnp.float32(1.0 - alpha) + jnp.float32(2.0 * alpha - 1.0) * t
    return alpha_t * _int_pow(one_m_pt, gamma) * bce


def _accumulate(pred_ref, target_ref, acc_ref, nrows: int, *, alpha, gamma):
    """Adds focal loss of the first `nrows` block rows into the accumulator."""
    full_chunks = nrows // ACC_ROWS
    rem = nrows - full_chunks * ACC_ROWS        # multiple of 8 (>=8) or 0

    def add_chunk(start, size):
        x = pred_ref[pl.ds(start, size), :].astype(jnp.float32)
        t = target_ref[pl.ds(start, size), :].astype(jnp.float32)
        f = _focal_elem(x, t, alpha, gamma)
        if size == ACC_ROWS:
            acc_ref[...] += f
        else:
            acc_ref[pl.ds(0, size), :] += f

    if 0 < full_chunks <= 4:
        # Short fixed trip count: static unroll for better LLO scheduling.
        for k in range(full_chunks):
            add_chunk(k * ACC_ROWS, ACC_ROWS)
    elif full_chunks > 4:
        def body(k, carry):
            add_chunk(pl.multiple_of(k * ACC_ROWS, ACC_ROWS), ACC_ROWS)
            return carry
        jax.lax.fori_loop(0, full_chunks, body, 0)
    if rem > 0:
        add_chunk(full_chunks * ACC_ROWS, rem)


def _make_kernel(*, alpha, gamma, tile_rows, tiles_per_core, num_tiles,
                 valid_last_rows, has_phantom):
    ragged = valid_last_rows != tile_rows

    def kernel(pred_ref, target_ref, out_ref, acc_ref):
        i = pl.program_id(1)                    # per-core reduction axis

        @pl.when(i == 0)
        def _init():
            acc_ref[...] = jnp.zeros_like(acc_ref)

        accum = functools.partial(_accumulate, pred_ref, target_ref, acc_ref,
                                  alpha=alpha, gamma=gamma)

        if ragged or has_phantom:
            g = pl.program_id(0) * tiles_per_core + i   # global tile index

        if ragged:
            # Globally-last tile: only `valid_last_rows` rows are real data;
            # process just those (static sizes) -- no per-element mask needed.
            @pl.when(g == num_tiles - 1)
            def _last_tile():
                accum(valid_last_rows)

            @pl.when(g < num_tiles - 1)         # phantom steps fall through
            def _full_tile():
                accum(tile_rows)
        elif has_phantom:
            @pl.when(g < num_tiles)             # skip compute on phantom step
            def _real_tile():
                accum(tile_rows)
        else:
            accum(tile_rows)

        @pl.when(i == tiles_per_core - 1)
        def _finalize():
            total = jnp.sum(acc_ref[...])
            r = jax.lax.broadcasted_iota(jnp.int32, (8, LANES), 0)
            l = jax.lax.broadcasted_iota(jnp.int32, (8, LANES), 1)
            out_ref[...] = jnp.where((r == 0) & (l == 0), total, 0.0)

    return kernel


def focal_loss(pred, target, alpha: float = 0.25, gamma: float = 2.0,
               reduction: str = "mean"):
    """JAX/Pallas equivalent of FocalLoss.forward (reduction='mean'|'sum')."""
    assert pred.shape == target.shape
    n = int(pred.size)

    rows = _cdiv(n, LANES)
    rows8 = _round_up(rows, 8)                  # minimal (8,128) alignment only
    padded_n = rows8 * LANES

    pred_f = jnp.reshape(pred, (-1,))
    target_f = jnp.reshape(target, (-1,))
    if padded_n != n:
        # Padded (pred=+30, target=1) pairs give exactly 0 focal loss in f32
        # for gamma > 0, so no validity mask is needed in the kernel.
        # NOTE: jnp.pad costs one extra HBM read+write of the inputs; aligned
        # shapes (n % 1024 == 0) skip it entirely.
        assert float(gamma) > 0.0, "zero-contribution padding requires gamma > 0"
        pred_f = jnp.pad(pred_f, (0, padded_n - n),
                         constant_values=jnp.asarray(PAD_LOGIT, pred_f.dtype))
        target_f = jnp.pad(target_f, (0, padded_n - n),
                           constant_values=jnp.asarray(1.0, target_f.dtype))
    pred_f = pred_f.reshape(rows8, LANES)
    target_f = target_f.reshape(rows8, LANES)

    if rows8 <= MAX_TILE_ROWS:
        tile_rows = rows8
        num_tiles = 1
    else:
        tile_rows = MAX_TILE_ROWS
        num_tiles = _cdiv(rows8, tile_rows)
    valid_last_rows = rows8 - (num_tiles - 1) * tile_rows

    # Always engage both v7x TensorCores when there is more than one tile;
    # odd tile counts get a "phantom" step whose compute is skipped in-kernel.
    ncore = 2 if num_tiles >= 2 else 1
    tiles_per_core = _cdiv(num_tiles, ncore)
    has_phantom = ncore * tiles_per_core > num_tiles

    if has_phantom:
        def in_map(c, i):
            return (jnp.minimum(c * tiles_per_core + i, num_tiles - 1), 0)
    else:
        def in_map(c, i):
            return (c * tiles_per_core + i, 0)

    kernel = _make_kernel(alpha=float(alpha), gamma=float(gamma),
                          tile_rows=tile_rows, tiles_per_core=tiles_per_core,
                          num_tiles=num_tiles, valid_last_rows=valid_last_rows,
                          has_phantom=has_phantom)

    cost = pl.CostEstimate(flops=22 * padded_n,
                           transcendentals=3 * padded_n,
                           bytes_accessed=8 * padded_n + ncore * 8 * LANES * 4)

    partials = pl.pallas_call(
        kernel,
        out_shape=jax.ShapeDtypeStruct((ncore * 8, LANES), jnp.float32),
        grid_spec=pltpu.PrefetchScalarGridSpec(
            num_scalar_prefetch=0,
            grid=(ncore, tiles_per_core),
            in_specs=[pl.BlockSpec((tile_rows, LANES), in_map),
                      pl.BlockSpec((tile_rows, LANES), in_map)],
            out_specs=pl.BlockSpec((8, LANES), lambda c, i: (c, 0)),
            scratch_shapes=[pltpu.VMEM((ACC_ROWS, LANES), jnp.float32)],
        ),
        compiler_params=pltpu.CompilerParams(
            dimension_semantics=("parallel", "arbitrary"),
            vmem_limit_bytes=VMEM_LIMIT_BYTES),
        cost_estimate=cost,
    )(pred_f, target_f)

    # Each core wrote its scalar partial at [c*8, 0]; everything else is 0.
    total = jnp.sum(partials)

    if reduction == "mean":
        # NOTE: f32 divide; for n > 2^24 elements use an f64 reciprocal if
        # exact parity with torch's mean is required.
        return total / jnp.float32(n)
    elif reduction == "sum":
        return total
    else:
        # TODO(synk): reduction='none' (per-element loss map) is not wired
        # through the sum-accumulator kernel; 'mean'/'sum' match the module.
        raise NotImplementedError("reduction='none' not implemented")


def _focal_loss_ref(pred, target, alpha=0.25, gamma=2.0):
    """Pure-JAX reference matching the PyTorch module (reduction='mean')."""
    x = pred.astype(jnp.float32)
    t = target.astype(jnp.float32)
    bce = jnp.maximum(x, 0.0) - x * t + jnp.log1p(jnp.exp(-jnp.abs(x)))
    p = jax.nn.sigmoid(x)
    pt = jnp.where(t == 1.0, p, 1.0 - p)
    alpha_t = jnp.where(t == 1.0, alpha, 1.0 - alpha)
    return jnp.mean(alpha_t * (1.0 - pt) ** gamma * bce)


if __name__ == "__main__":
    key = jax.random.PRNGKey(0)
    ks = jax.random.split(key, 8)

    def check(pred, target):
        out = jax.block_until_ready(focal_loss(pred, target))
        ref = _focal_loss_ref(pred, target)
        assert jnp.allclose(out, ref, rtol=1e-5, atol=1e-5), (out, ref)

    # 1) Module-spec shape (B, C, H, W) = (2, 4, 16, 16): single tile, no pad.
    p = jax.random.normal(ks[0], (2, 4, 16, 16), dtype=jnp.float32)
    t = (jax.random.uniform(ks[1], (2, 4, 16, 16)) > 0.5).astype(jnp.float32)
    check(p, t)

    # 2) Unaligned shape: exercises the zero-contribution padding path.
    p = jax.random.normal(ks[2], (1, 3, 17, 19), dtype=jnp.float32)
    t = (jax.random.uniform(ks[3], (1, 3, 17, 19)) > 0.5).astype(jnp.float32)
    check(p, t)

    # 3) Single large tile with several accumulator chunks.
    p = jax.random.normal(ks[4], (2, 8, 128, 128), dtype=jnp.float32)
    t = (jax.random.uniform(ks[5], (2, 8, 128, 128)) > 0.5).astype(jnp.float32)
    check(p, t)

    # 4) Multi-tile: 2-core split with an odd tile count (phantom step) and a
    #    ragged last tile handled without padding or per-element masking.
    p = jax.random.normal(ks[6], (2, 4, 513, 512), dtype=jnp.float32)
    t = (jax.random.uniform(ks[7], (2, 4, 513, 512)) > 0.5).astype(jnp.float32)
    check(p, t)

    print("KERNEL_OK")
</pallas_src>

<mosaic_0001>
module attributes {stable_mosaic.version = 11 : i64} {
  func.func @kernel(%arg0: i32, %arg1: i32, %arg2: memref<16x128xf32, #tpu.memory_space<vmem>>, %arg3: memref<16x128xf32, #tpu.memory_space<vmem>>, %arg4: memref<8x128xf32, #tpu.memory_space<vmem>>, %arg5: memref<512x128xf32, #tpu.memory_space<vmem>>) attributes {dimension_semantics = [#tpu.dimension_semantics<parallel>, #tpu.dimension_semantics<arbitrary>], iteration_bounds = array<i64: 1, 1>, scalar_prefetch = 0 : i64, scratch_operands = 1 : i64, tpu.core_type = #tpu.core_type<tc>, window_params = [{transform_indices = @transform_0, window_bounds = array<i64: 16, 128>}, {transform_indices = @transform_1, window_bounds = array<i64: 16, 128>}, {transform_indices = @transform_2, window_bounds = array<i64: 8, 128>}]} {
    %c0_i32 = arith.constant 0 : i32
    %0 = arith.cmpi eq, %arg1, %c0_i32 : i32
    %1 = arith.extui %0 : i1 to i32
    %c0_i32_0 = arith.constant 0 : i32
    %2 = arith.cmpi ne, %1, %c0_i32_0 : i32
    scf.if %2 {
      %cst_18 = arith.constant 0.000000e+00 : f32
      %44 = vector.broadcast %cst_18 : f32 to vector<512x128xf32>
      %c0_19 = arith.constant 0 : index
      %c0_20 = arith.constant 0 : index
      %45 = vector.load %arg5[%c0_19, %c0_20] : memref<512x128xf32, #tpu.memory_space<vmem>>, vector<512x128xf32>
      tpu.vector_store %arg5[%c0_19, %c0_20], %44 {strides = array<i32>} : memref<512x128xf32, #tpu.memory_space<vmem>>, vector<512x128xf32>,
    } else {
    }
    %c0 = arith.constant 0 : index
    %c0_1 = arith.constant 0 : index
    %3 = vector.load %arg2[%c0, %c0_1] : memref<16x128xf32, #tpu.memory_space<vmem>>, vector<16x128xf32>
    %c0_2 = arith.constant 0 : index
    %c0_3 = arith.constant 0 : index
    %4 = vector.load %arg3[%c0_2, %c0_3] : memref<16x128xf32, #tpu.memory_space<vmem>>, vector<16x128xf32>
    %5 = math.absf %3 : vector<16x128xf32>
    %cst = arith.constant 0.000000e+00 : f32
    %6 = vector.broadcast %cst : f32 to vector<16x128xf32>
    %7 = arith.subf %6, %5 : vector<16x128xf32>
    %8 = math.exp %7 : vector<16x128xf32>
    %cst_4 = arith.constant 1.000000e+00 : f32
    %9 = vector.broadcast %cst_4 : f32 to vector<16x128xf32>
    %10 = arith.addf %9, %8 : vector<16x128xf32>
    %cst_5 = arith.constant 0.000000e+00 : f32
    %11 = vector.broadcast %cst_5 : f32 to vector<16x128xf32>
    %12 = arith.maximumf %3, %11 : vector<16x128xf32>
    %13 = arith.mulf %3, %4 : vector<16x128xf32>
    %14 = arith.subf %12, %13 : vector<16x128xf32>
    %15 = math.log %10 : vector<16x128xf32>
    %16 = arith.addf %14, %15 : vector<16x128xf32>
    %17 = tpu.reciprocal %10 {approx = true} : vector<16x128xf32> -> vector<16x128xf32>
    %18 = arith.mulf %10, %17 : vector<16x128xf32>
    %cst_6 = arith.constant 2.000000e+00 : f32
    %19 = vector.broadcast %cst_6 : f32 to vector<16x128xf32>
    %20 = arith.subf %19, %18 : vector<16x128xf32>
    %21 = arith.mulf %17, %20 : vector<16x128xf32>
    %cst_7 = arith.constant 0.000000e+00 : f32
    %22 = vector.broadcast %cst_7 : f32 to vector<16x128xf32>
    %23 = arith.cmpf oge, %3, %22 : vector<16x128xf32>
    %24 = arith.mulf %8, %21 : vector<16x128xf32>
    %25 = arith.select %23, %21, %24 : vector<16x128xi1>, vector<16x128xf32>
    %cst_8 = arith.constant 1.000000e+00 : f32
    %26 = vector.broadcast %cst_8 : f32 to vector<16x128xf32>
    %27 = arith.cmpf oeq, %4, %26 : vector<16x128xf32>
    %cst_9 = arith.constant 1.000000e+00 : f32
    %28 = vector.broadcast %cst_9 : f32 to vector<16x128xf32>
    %29 = arith.subf %28, %25 : vector<16x128xf32>
    %30 = arith.select %27, %29, %25 : vector<16x128xi1>, vector<16x128xf32>
    %cst_10 = arith.constant -5.000000e-01 : f32
    %31 = vector.broadcast %cst_10 : f32 to vector<16x128xf32>
    %32 = arith.mulf %31, %4 : vector<16x128xf32>
    %cst_11 = arith.constant 7.500000e-01 : f32
    %33 = vector.broadcast %cst_11 : f32 to vector<16x128xf32>
    %34 = arith.addf %33, %32 : vector<16x128xf32>
    %35 = arith.mulf %30, %30 : vector<16x128xf32>
    %36 = arith.mulf %34, %35 : vector<16x128xf32>
    %37 = arith.mulf %36, %16 : vector<16x128xf32>
    %c0_12 = arith.constant 0 : index
    %c0_13 = arith.constant 0 : index
    %38 = vector.load %arg5[%c0_12, %c0_13] : memref<512x128xf32, #tpu.memory_space<vmem>>, vector<16x128xf32>
    %39 = arith.addf %38, %37 : vector<16x128xf32>
    %c0_14 = arith.constant 0 : index
    %c0_15 = arith.constant 0 : index
    %40 = vector.load %arg5[%c0_14, %c0_15] : memref<512x128xf32, #tpu.memory_space<vmem>>, vector<16x128xf32>
    tpu.vector_store %arg5[%c0_14, %c0_15], %39 {strides = array<i32>} : memref<512x128xf32, #tpu.memory_space<vmem>>, vector<16x128xf32>,
    %c0_i32_16 = arith.constant 0 : i32
    %41 = arith.cmpi eq, %arg1, %c0_i32_16 : i32
    %42 = arith.extui %41 : i1 to i32
    %c0_i32_17 = arith.constant 0 : i32
    %43 = arith.cmpi ne, %42, %c0_i32_17 : i32
    scf.if %43 {
      %c0_18 = arith.constant 0 : index
      %c0_19 = arith.constant 0 : index
      %44 = vector.load %arg5[%c0_18, %c0_19] : memref<512x128xf32, #tpu.memory_space<vmem>>, vector<512x128xf32>
      %45 = vector.shape_cast %44 : vector<512x128xf32> to vector<1x512x128xf32>
      %cst_20 = arith.constant dense<0.000000e+00> : vector<1xf32>
      %46 = vector.multi_reduction <add>, %45, %cst_20 [1, 2] : vector<1x512x128xf32> to vector<1xf32>
      %47 = vector.shape_cast %46 : vector<1xf32> to vector<1x1x1xf32>
      %48 = vector.extract %47[0, 0, 0] : f32 from vector<1x1x1xf32>
      %49 = tpu.iota {dimensions = array<i32: 0>} : vector<8x128xi32>
      %50 = tpu.iota {dimensions = array<i32: 1>} : vector<8x128xi32>
      %c0_i32_21 = arith.constant 0 : i32
      %51 = vector.broadcast %c0_i32_21 : i32 to vector<8x128xi32>
      %52 = arith.cmpi eq, %49, %51 : vector<8x128xi32>
      %c0_i32_22 = arith.constant 0 : i32
      %53 = vector.broadcast %c0_i32_22 : i32 to vector<8x128xi32>
      %54 = arith.cmpi eq, %50, %53 : vector<8x128xi32>
      %55 = arith.andi %52, %54 : vector<8x128xi1>
      %cst_23 = arith.constant 0.000000e+00 : f32
      %56 = vector.broadcast %48 : f32 to vector<8x128xf32>
      %57 = vector.broadcast %cst_23 : f32 to vector<8x128xf32>
      %58 = arith.select %55, %56, %57 : vector<8x128xi1>, vector<8x128xf32>
      %c0_24 = arith.constant 0 : index
      %c0_25 = arith.constant 0 : index
      %59 = vector.load %arg4[%c0_24, %c0_25] : memref<8x128xf32, #tpu.memory_space<vmem>>, vector<8x128xf32>
      tpu.vector_store %arg4[%c0_24, %c0_25], %58 {strides = array<i32>} : memref<8x128xf32, #tpu.memory_space<vmem>>, vector<8x128xf32>,
    } else {
    }
    return
  }
  func.func @transform_0(%arg0: i32, %arg1: i32) -> (i32, i32) {
    %c1_i32 = arith.constant 1 : i32
    %0 = arith.muli %arg0, %c1_i32 : i32
    %1 = arith.addi %0, %arg1 : i32
    %c0_i32 = arith.constant 0 : i32
    %c0_i32_0 = arith.constant 0 : i32
    return %1, %c0_i32 : i32, i32
  }
  func.func @transform_1(%arg0: i32, %arg1: i32) -> (i32, i32) {
    %c1_i32 = arith.constant 1 : i32
    %0 = arith.muli %arg0, %c1_i32 : i32
    %1 = arith.addi %0, %arg1 : i32
    %c0_i32 = arith.constant 0 : i32
    %c0_i32_0 = arith.constant 0 : i32
    return %1, %c0_i32 : i32, i32
  }
  func.func @transform_2(%arg0: i32, %arg1: i32) -> (i32, i32) {
    %c0_i32 = arith.constant 0 : i32
    %c0_i32_0 = arith.constant 0 : i32
    return %arg0, %c0_i32 : i32, i32
  }
}

</mosaic_0001>

<bundles_post_ra>
// kernel: tpu_custom_call.1
= control target key start
LH: loop header
LB: loop body
LE: loop exit
PB: predicated region body
PF: predicated region fallthrough
CT: control target
= control target key end

     0   :  { %7 = vsyncpa [#allocation4], 0  ;;  %s494_s0 = inlined_call_operand.hbm [shape: f32[16,128], index: 0, kind: input, shape index: {}]   ;;  %s495_s1 = inlined_call_operand.hbm [shape: f32[16,128], index: 1, kind: input, shape index: {}]   ;;  %s496_s2 = inlined_call_operand.hbm [shape: f32[8,128], index: 2, kind: output, shape index: {}]  }
   0x1   :  { %8 = vsyncpa [#allocation7], 0 }
   0x2   :  { %9 = vsyncpa [#allocation5], 0  ;;  %s438_s9 = smov [#allocation3]   ;;  %s366_s13 = scalar_lea.hbm %s494_s0, 256 }
   0x3   :  { %s19_s10 = sshll.u32 %s438_s9, 4  ;;  %p367_p0 = scmp.ne.s32.totalorder %s494_s0, %s366_s13  ;;  %s20_s10 = int_to_ptr.vmem [resolvable:$true] %s19_s10 }
   0x4   :  { %p370_p1 = scmp.lt.u32.totalorder %s366_s13, %s494_s0 }
   0x6   :  { %p372_p2 = pnand %p370_p1, %p367_p0 }
   0x8   :  { %375 = shalt.err (!%p372_p2)
}
   0x9   :  { %s376_s18 = scalar_lea.vmem %s20_s10, 256  ;;  %p381_p4 = scmp.lt.s32.totalorder %s20_s10, %s20_s10 }
   0xa   :  { %p377_p3 = scmp.ne.s32.totalorder %s20_s10, %s376_s18  ;;  %p382_p5 = scmp.lt.s32.totalorder %s376_s18, %s376_s18 }
   0xc   :  { %p383_p6 = por %p382_p5, %p381_p4 }
   0xe   :  { %p384_p7 = pnand %p383_p6, %p377_p3 }
  0x10   :  { %387 = shalt.err (!%p384_p7)
}
  0x11   :  { %s439_s19 = smov 128   ;;  %s440_s20 = smov 8  }
  0x12   :  { %25 = dma.hbm_to_vmem [thread:$0]  %s494_s0, 256, %s20_s10, [#allocation4], %s439_s19, %s439_s19, %s440_s20  }
  0x13   :  { %s441_s23 = smov [#allocation6]   ;;  %s388_s27 = scalar_lea.hbm %s495_s1, 256 }
  0x14   :  { %s35_s24 = sshll.u32 %s441_s23, 4  ;;  %p389_p8 = scmp.ne.s32.totalorder %s495_s1, %s388_s27  ;;  %s36_s24 = int_to_ptr.vmem [resolvable:$true] %s35_s24 }
  0x15   :  { %p392_p9 = scmp.lt.u32.totalorder %s388_s27, %s495_s1 }
  0x17   :  { %p394_p10 = pnand %p392_p9, %p389_p8 }
  0x19   :  { %397 = shalt.err (!%p394_p10)
}
  0x1a   :  { %s398_s4 = scalar_lea.vmem %s36_s24, 256  ;;  %p403_p12 = scmp.lt.s32.totalorder %s36_s24, %s36_s24 }
  0x1b   :  { %p399_p11 = scmp.ne.s32.totalorder %s36_s24, %s398_s4  ;;  %p404_p13 = scmp.lt.s32.totalorder %s398_s4, %s398_s4 }
  0x1d   :  { %p405_p0 = por %p404_p13, %p403_p12 }
  0x1f   :  { %p406_p1 = pnand %p405_p0, %p399_p11 }
  0x21   :  { %409 = shalt.err (!%p406_p1)
}
  0x22   :  { %41 = dma.hbm_to_vmem [thread:$0]  %s495_s1, 256, %s36_s24, [#allocation7], %s439_s19, %s439_s19, %s440_s20  }
  0x23   :  { %432 = dma.done.wait [#allocation4], 256  }
  0x24   :  { %433 = vsyncadd [#allocation4], 4294967040 }
  0x25   :  { %434 = dma.done.wait [#allocation7], 256  }
  0x26   :  { %435 = vsyncadd [#allocation7], 4294967040  ;;  %v120_v0 = vld [vmem:[#allocation3] sm:$0xff]  ;;  %v121_v1 = vld [vmem:[#allocation3 + $0x8] sm:$0xff]  ;;  %v321_v60 = vlaneseq  ;;  %s442_s1 = smov [#allocation8]  }
  0x27   :  { %v124_v2 = vand.u32 2147483647, %v120_v0  ;;  %v125_v3 = vand.u32 2147483647, %v121_v1  ;;  %v122_v14 = vld [vmem:[#allocation6] sm:$0xff]  ;;  %v123_v16 = vld [vmem:[#allocation6 + $0x8] sm:$0xff] }
  0x28   :  { %v134_v19 = vmax.f32 %v120_v0, 0.0  ;;  %v136_v20 = vmul.f32 %v122_v14, %v120_v0  ;;  %v135_v22 = vmax.f32 %v121_v1, 0.0  ;;  %v137_v23 = vmul.f32 %v123_v16, %v121_v1  ;;  %s337_s6 = sshll.u32 %s442_s1, 4  ;;  %s338_s6 = int_to_ptr.vmem [resolvable:$true] %s337_s6 }
  0x29   :  { %v126_v4 = vsub.f32 0.0, %v124_v2  ;;  %v127_v5 = vsub.f32 0.0, %v125_v3  ;;  %vm154_vm0 = vcmp.ge.f32.partialorder %v120_v0, 0.0  ;;  %vm155_vm1 = vcmp.ge.f32.partialorder %v121_v1, 0.0  ;;  %s410_s8 = scalar_lea.vmem %s338_s6, 128  ;;  %p415_p3 = scmp.lt.s32.totalorder %s338_s6, %s338_s6 }
  0x2a   :  { %v166_v29 = vmul.f32 -0.5, %v122_v14  ;;  %v138_v30 = vsub.f32 %v134_v19, %v136_v20  ;;  %v167_v32 = vmul.f32 -0.5, %v123_v16  ;;  %v139_v33 = vsub.f32 %v135_v22, %v137_v23  ;;  %p411_p2 = scmp.ne.s32.totalorder %s338_s6, %s410_s8  ;;  %p416_p4 = scmp.lt.s32.totalorder %s410_s8, %s410_s8 }
  0x2b   :  { %v128_v6 = vmul.f32 1.442695, %v126_v4  ;;  %v130_v7 = vmul.f32 1.442695, %v127_v5  ;;  %vm160_vm2 = vcmp.eq.f32.partialorder %v122_v14, 1.0  ;;  %vm161_vm3 = vcmp.eq.f32.partialorder %v123_v16, 1.0 }
  0x2c   :  { %v168_v40 = vadd.f32 0.75, %v166_v29  ;;  %v169_v42 = vadd.f32 0.75, %v167_v32  ;;  %v322_v61 = vshrl.u32 %v321_v60, 7  ;;  %v324_v62 = vand.u32 127, %v321_v60  ;;  %p417_p5 = por %p416_p4, %p415_p3 }
  0x2d   :  { %354 = vpow2.f32 %v128_v6 }
  0x2e   :  { %356 = vpow2.f32 %v130_v7  ;;  %vm325_vm4 = vcmp.eq.s32.totalorder %v322_v61, 0  ;;  %vm326_vm5 = vcmp.eq.s32.totalorder %v324_v62, 0  ;;  %p418_p6 = pnand %p417_p5, %p411_p2 }
  0x2f   :  { %vm327_vm6 = vmand %vm325_vm4, %vm326_vm5 }
  0x37   :  { %v355_v8 = vpop.eup %354 }
  0x38   :  { %v357_v9 = vpop.eup %356  ;;  %v132_v10 = vadd.f32 1.0, %v355_v8 }
  0x39   :  { %v133_v11 = vadd.f32 1.0, %v357_v9 }
  0x3a   :  { %358 = vrcp.f32 %v132_v10 }
  0x3b   :  { %360 = vrcp.f32 %v133_v11 }
  0x3c   :  { %362 = vlog2.f32 %v132_v10 }
  0x3d   :  { %364 = vlog2.f32 %v133_v11 }
  0x44   :  { %v359_v12 = vpop.eup %358 }
  0x45   :  { %v361_v13 = vpop.eup %360  ;;  %v148_v15 = vmul.f32 %v359_v12, %v132_v10 }
  0x46   :  { %v149_v17 = vmul.f32 %v361_v13, %v133_v11  ;;  %v363_v25 = vpop.eup %362 }
  0x47   :  { %v150_v18 = vsub.f32 2.0, %v148_v15  ;;  %v365_v27 = vpop.eup %364  ;;  %v141_v34 = vmul.f32 0.6931472, %v363_v25 }
  0x48   :  { %v151_v21 = vsub.f32 2.0, %v149_v17  ;;  %v143_v36 = vmul.f32 0.6931472, %v365_v27 }
  0x49   :  { %v152_v24 = vmul.f32 %v359_v12, %v150_v18  ;;  %v144_v43 = vadd.f32 %v141_v34, %v138_v30 }
  0x4a   :  { %v153_v26 = vmul.f32 %v361_v13, %v151_v21  ;;  %v145_v46 = vadd.f32 %v143_v36, %v139_v33 }
  0x4b   :  { %v156_v28 = vmul.f32 %v355_v8, %v152_v24 }
  0x4c   :  { %v157_v31 = vmul.f32 %v357_v9, %v153_v26 }
  0x4d   :  { %v158_v35 = vsel %vm154_vm0, %v152_v24, %v156_v28 }
  0x4e   :  { %v159_v37 = vsel %vm155_vm1, %v153_v26, %v157_v31  ;;  %v162_v38 = vsub.f32 1.0, %v158_v35 }
  0x4f   :  { %v163_v39 = vsub.f32 1.0, %v159_v37 }
  0x50   :  { %v164_v41 = vsel %vm160_vm2, %v162_v38, %v158_v35 }
  0x51   :  { %v165_v44 = vsel %vm161_vm3, %v163_v39, %v159_v37  ;;  %v170_v45 = vmul.f32 %v164_v41, %v164_v41 }
  0x52   :  { %v171_v47 = vmul.f32 %v165_v44, %v165_v44 }
  0x53   :  { %v172_v48 = vmul.f32 %v170_v45, %v168_v40 }
  0x54   :  { %v173_v49 = vmul.f32 %v171_v47, %v169_v42 }
  0x55   :  { %v174_v50 = vmul.f32 %v172_v48, %v144_v43 }
  0x56   :  { %v175_v51 = vmul.f32 %v173_v49, %v145_v46 }
  0x58   :  { %v249_v52 = vadd.f32 %v175_v51, %v174_v50 }
  0x5a   :  { %312 = vadd.xlane.f32.xlu0 %v249_v52 }
  0xe7   :  { %v313_v53 = vpop.xlane.xlu0 %312 }
  0xe8   :  { %v314_v54 = vrot.slane %v313_v53, 4 }
  0xea   :  { %v315_v55 = vadd.f32 %v314_v54, %v313_v53 }
  0xec   :  { %v316_v56 = vrot.slane %v315_v55, 2 }
  0xee   :  { %v317_v57 = vadd.f32 %v316_v56, %v315_v55 }
  0xf0   :  { %v318_v58 = vrot.slane %v317_v57, 1 }
  0xf2   :  { %v319_v59 = vadd.f32 %v318_v58, %v317_v57 }
  0xf4   :  { %347 = vpush %v319_v59 }
 0x125   :  { %s348_s7 = spop %347 }
 0x126   :  { %v328_v63 = vstv %s348_s7 }
 0x127   :  { %v329_v0 = vsel %vm327_vm6, %v328_v63, 0.0 }
 0x128   :  { %330 = vst [vmem:[#allocation8] sm:$0xff] %v329_v0 }
 0x129   :  { %421 = shalt.err (!%p418_p6)
}
 0x12a   :  { %s422_s11 = scalar_lea.hbm %s496_s2, 128 }
 0x12b   :  { %p423_p7 = scmp.ne.s32.totalorder %s496_s2, %s422_s11  ;;  %p426_p8 = scmp.lt.u32.totalorder %s422_s11, %s496_s2 }
 0x12d   :  { %p428_p9 = pnand %p426_p8, %p423_p7 }
 0x12f   :  { %431 = shalt.err (!%p428_p9)
}
 0x130   :  { %340 = dma.vmem_to_hbm [thread:$0]  %s338_s6, 128, %s496_s2, [#allocation5]  }
 0x131   :  { %436 = dma.done.wait [#allocation5], 128  }
 0x132   :  { %437 = vsyncadd [#allocation5], 4294967168 }
 0x133   :  { %344 = vsyncpa [#allocation4], 1 }
 0x134   :  { %345 = vsyncpa [#allocation7], 1 }
 0x135   :  { %346 = vsyncpa [#allocation5], 1 }

</bundles_post_ra>
